<compile_context>
chip_gen: v7x
topology: tpu7x:2x2x1
jax: 0.10.0
libtpu: 0.0.40
codegen_flags: <defaults>
</compile_context>

<pallas_src>
import numpy as np
import jax
import jax.numpy as jnp
from jax.experimental import pallas as pl
from jax.experimental.pallas import tpu as pltpu


# ---------------------------------------------------------------------------
# Pallas kernel: one grid step per branch (parallel); per-branch output block.
# ---------------------------------------------------------------------------
def spellb_kernel(x_ref, bn0_ref, a_ref, w12_ref, w2_ref, wlr2_ref, wlr3_ref,
                  vec_ref, out_ref):
    N, C1 = x_ref.shape
    C2 = w2_ref.shape[1]
    F = wlr3_ref.shape[1]

    # ---- unpack the per-branch bias / BN vectors (single DMA'd block) --------
    vec = vec_ref[...]                       # [10, Cmax]
    b1 = vec[0:1, :C1]
    b2 = vec[1:2, :C2]
    bn1s = vec[2:3, :C2]
    bn1b = vec[3:4, :C2]
    bl2 = vec[4:5, :C2]
    bn2s = vec[5:6, :C2]
    bn2b = vec[6:7, :C2]
    bl3 = vec[7:8, :F]
    bn3s = vec[8:9, :F]
    bn3b = vec[9:10, :F]

    # ---- BatchNorm01 (folded scale/shift) + ReLU ------------------------------
    bn0 = bn0_ref[...]                       # [2, C1]: row 0 = scale, row 1 = shift
    x0 = jnp.maximum(x_ref[...] * bn0[0:1, :] + bn0[1:2, :], 0.0)     # [N, C1]

    A = a_ref[...]                           # [N, N], A[i, j] = 1 iff edge j -> i
    deg = jnp.sum(A, axis=1, keepdims=True)  # [N, 1]
    has_nb = deg > 0.0
    # computed early so the divide hides under the EdgeConv matmul work
    inv_deg = pl.reciprocal(jnp.maximum(deg, 1.0), approx=False)

    # ---- EdgeConv (max aggregation), online max over source chunks ------------
    # message(i, j) = W2 @ relu(W1a x_i + W1b (x_j - x_i) + b1) + b2
    #              = W2 @ relu((xa_i - xb_i + b1) + xb_j) + b2
    # b2 is constant per channel -> hoisted outside the max.
    xab = jnp.dot(x0, w12_ref[...], preferred_element_type=jnp.float32)  # [N, 2*C1]
    xa = xab[:, :C1]
    xb = xab[:, C1:]
    pre_i = xa - xb + b1                                                 # [N, C1]

    NEG = jnp.float32(-1e30)
    w2 = w2_ref[...]
    TJ = min(N, 256)                         # source-chunk size (static)
    x1 = jnp.full((N, C2), NEG, jnp.float32)
    j0 = 0
    while j0 < N:                            # static python loop -> unrolled
        tj = min(TJ, N - j0)
        h = jnp.maximum(pre_i[:, None, :] + xb[j0:j0 + tj][None, :, :], 0.0)  # [N, tj, C1]
        m = jnp.dot(h.reshape(N * tj, C1), w2,
                    preferred_element_type=jnp.float32).reshape(N, tj, C2)
        m = jnp.where(A[:, j0:j0 + tj][:, :, None] > 0.0, m, NEG)
        x1 = jnp.maximum(x1, jnp.max(m, axis=1))
        j0 += tj
    x1 = x1 + b2                             # hoisted EdgeConv output bias
    x1 = jnp.where(has_nb, x1, 0.0)          # empty neighborhoods -> 0 (PyG scatter-max)
    x1 = jnp.maximum(x1 * bn1s + bn1b, 0.0)  # BN + ReLU (dropout = identity)

    # ---- SAGEConv 2 (mean aggregation): one fused matmul -----------------------
    agg2 = jnp.dot(A, x1, preferred_element_type=jnp.float32) * inv_deg
    x2 = jnp.dot(jnp.concatenate([agg2, x1], axis=-1), wlr2_ref[...],
                 preferred_element_type=jnp.float32) + bl2
    x2 = jnp.maximum(x2 * bn2s + bn2b, 0.0)  # BN + ReLU

    # ---- SAGEConv 3 (mean aggregation): one fused matmul -----------------------
    agg3 = jnp.dot(A, x2, preferred_element_type=jnp.float32) * inv_deg
    x3 = jnp.dot(jnp.concatenate([agg3, x2], axis=-1), wlr3_ref[...],
                 preferred_element_type=jnp.float32) + bl3
    x3 = x3 * bn3s + bn3b                    # BN (no ReLU on final)

    out_ref[...] = x3.astype(out_ref.dtype)  # per-branch output block (no race)


def spellb_forward(x, adjs, packed):
    """x: [N, C1]; adjs: [3, N, N]; packed: dict of pre-fused / stacked params."""
    # Replicates the original module's guard (it checks x.size(1) despite the message).
    if x.shape[1] < 5:
        raise ValueError('Input tensor must have at least five dimensions')
    N, C1 = x.shape
    C2 = packed['w2'].shape[-1]
    F = packed['wlr3'].shape[-1]
    Cmax = packed['vecs'].shape[-1]

    def bspec(d0, d1):
        return pl.BlockSpec((None, d0, d1), lambda b: (b, 0, 0))

    per_branch = pl.pallas_call(
        spellb_kernel,
        out_shape=jax.ShapeDtypeStruct((3, N, F), jnp.float32),
        grid_spec=pltpu.PrefetchScalarGridSpec(
            num_scalar_prefetch=0,
            grid=(3,),
            in_specs=[
                pl.BlockSpec((N, C1), lambda b: (0, 0)),   # x (shared)
                pl.BlockSpec((2, C1), lambda b: (0, 0)),   # bn0 scale/shift (shared)
                bspec(N, N),                               # adjacency
                bspec(C1, 2 * C1),                         # [W1a | W1b]
                bspec(C1, C2),                             # W2
                bspec(2 * C2, C2),                         # [Wl2 ; Wr2]
                bspec(2 * C2, F),                          # [Wl3 ; Wr3]
                bspec(10, Cmax),                           # packed bias/BN vectors
            ],
            out_specs=pl.BlockSpec((None, N, F), lambda b: (b, 0, 0)),
        ),
        compiler_params=pltpu.CompilerParams(dimension_semantics=("parallel",)),
    )(x, packed['bn0'], adjs, packed['w12'], packed['w2'],
      packed['wlr2'], packed['wlr3'], packed['vecs'])

    # tiny 3-way reduction outside the kernel (keeps the branch grid race-free /
    # megacore-parallel on v7x)
    return jnp.sum(per_branch, axis=0)


# ---------------------------------------------------------------------------
# Host-side parameter packing (fuse paired matmuls, pack small vectors).
# ---------------------------------------------------------------------------
def _pad_row(v, cmax):
    v = v.reshape(-1)
    return jnp.pad(v, (0, cmax - v.shape[0]))


def pack_branch_params(p, cmax):
    rows = [p['b1'], p['b2'], p['bn1s'], p['bn1b'], p['bl2'],
            p['bn2s'], p['bn2b'], p['bl3'], p['bn3s'], p['bn3b']]
    return dict(
        w12=jnp.concatenate([p['w1a'], p['w1b']], axis=1),
        w2=p['w2'],
        wlr2=jnp.concatenate([p['wl2'], p['wr2']], axis=0),
        wlr3=jnp.concatenate([p['wl3'], p['wr3']], axis=0),
        vecs=jnp.stack([_pad_row(r, cmax) for r in rows]).astype(jnp.float32),
    )


# ---------------------------------------------------------------------------
# Pure-JAX reference (scatter/segment based) for correctness check.
# ---------------------------------------------------------------------------
def _edgeconv_ref(x, src, dst, p, n):
    xi, xj = x[dst], x[src]
    h = jax.nn.relu(xi @ p['w1a'] + (xj - xi) @ p['w1b'] + p['b1'][0])
    m = h @ p['w2'] + p['b2'][0]
    out = jax.ops.segment_max(m, dst, num_segments=n)
    deg = jax.ops.segment_sum(jnp.ones((src.shape[0],), jnp.float32), dst, num_segments=n)
    return jnp.where((deg > 0)[:, None], out, 0.0)


def _sage_ref(x, src, dst, wl, bl, wr, n):
    s = jax.ops.segment_sum(x[src], dst, num_segments=n)
    deg = jax.ops.segment_sum(jnp.ones((src.shape[0],), jnp.float32), dst, num_segments=n)
    agg = s / jnp.maximum(deg, 1.0)[:, None]
    return agg @ wl + bl[0] + x @ wr


def _branch_ref(x0, src, dst, p, n):
    x1 = _edgeconv_ref(x0, src, dst, p, n)
    x1 = jax.nn.relu(x1 * p['bn1s'][0] + p['bn1b'][0])
    x2 = _sage_ref(x1, src, dst, p['wl2'], p['bl2'], p['wr2'], n)
    x2 = jax.nn.relu(x2 * p['bn2s'][0] + p['bn2b'][0])
    x3 = _sage_ref(x2, src, dst, p['wl3'], p['bl3'], p['wr3'], n)
    return x3 * p['bn3s'][0] + p['bn3b'][0]


# ---------------------------------------------------------------------------
# Parameter construction (deterministic, synthetic — no checkpoint loading).
# ---------------------------------------------------------------------------
def _dense(key, shape, scale=0.3):
    return (scale * jax.random.normal(key, shape)).astype(jnp.float32)


def _bn(key, c):
    k1, k2, k3, k4 = jax.random.split(key, 4)
    gamma = 1.0 + 0.1 * jax.random.normal(k1, (c,))
    beta = 0.1 * jax.random.normal(k2, (c,))
    mean = 0.1 * jax.random.normal(k3, (c,))
    var = jax.random.uniform(k4, (c,), minval=0.5, maxval=1.5)
    scale = gamma * jax.lax.rsqrt(var + 1e-5)
    shift = beta - mean * scale
    return (scale.reshape(1, c).astype(jnp.float32),
            shift.reshape(1, c).astype(jnp.float32))


def make_branch_params(key, c1, c2, f):
    ks = jax.random.split(key, 12)
    bn1s, bn1b = _bn(ks[6], c2)
    bn2s, bn2b = _bn(ks[7], c2)
    bn3s, bn3b = _bn(ks[8], f)
    return dict(
        w1a=_dense(ks[0], (c1, c1)), w1b=_dense(ks[1], (c1, c1)),
        b1=_dense(ks[2], (1, c1), 0.1),
        w2=_dense(ks[3], (c1, c2)), b2=_dense(ks[4], (1, c2), 0.1),
        bn1s=bn1s, bn1b=bn1b,
        wl2=_dense(ks[5], (c2, c2)), bl2=_dense(ks[9], (1, c2), 0.1),
        wr2=_dense(ks[10], (c2, c2)),
        bn2s=bn2s, bn2b=bn2b,
        wl3=_dense(ks[11], (c2, f)), bl3=_dense(jax.random.fold_in(key, 99), (1, f), 0.1),
        wr3=_dense(jax.random.fold_in(key, 100), (c2, f)),
        bn3s=bn3s, bn3b=bn3b,
    )


if __name__ == "__main__":
    key = jax.random.PRNGKey(0)
    N, C1, C2, F, E = 16, 8, 16, 8, 24   # cfg: channel1=8, channel2=16, final_dim=8

    k_e, k_a, k_x, k_p0, k_p1, k_p2, k_bn0 = jax.random.split(key, 7)

    # --- graph: E unique directed edges, attr in {-1, 0, +1} -------------------
    perm = jax.random.permutation(k_e, N * N)[:E]
    src = (perm // N).astype(jnp.int32)
    dst = (perm % N).astype(jnp.int32)
    edge_attr = (jax.random.randint(k_a, (E,), 0, 3) - 1).astype(jnp.float32)
    x = jax.random.normal(k_x, (N, C1), jnp.float32)

    # --- edge filtering + dense adjacency (host-side glue) ---------------------
    src_np, dst_np = np.asarray(src), np.asarray(dst)
    attr_np = np.asarray(edge_attr)
    edge_sets = [
        (src_np[attr_np <= 0], dst_np[attr_np <= 0]),   # edge_index_f
        (src_np[attr_np >= 0], dst_np[attr_np >= 0]),   # edge_index_b
        (src_np, dst_np),                               # edge_index
    ]
    adj_np = np.zeros((3, N, N), np.float32)
    for b, (s_, d_) in enumerate(edge_sets):
        adj_np[b, d_, s_] = 1.0                         # A[target, source]
    adjs = jnp.asarray(adj_np)

    # --- parameters -------------------------------------------------------------
    bn0s, bn0b = _bn(k_bn0, C1)
    branch_params = [make_branch_params(k, C1, C2, F) for k in (k_p0, k_p1, k_p2)]

    cmax = max(C1, C2, F)
    packed_branches = [pack_branch_params(p, cmax) for p in branch_params]
    packed = {k: jnp.stack([pb[k] for pb in packed_branches])
              for k in packed_branches[0]}
    packed['bn0'] = jnp.concatenate([bn0s, bn0b], axis=0)   # [2, C1]

    # --- run Pallas kernel ------------------------------------------------------
    out = spellb_forward(x, adjs, packed)
    out = jax.block_until_ready(out)

    # --- pure-JAX reference -----------------------------------------------------
    x0 = jax.nn.relu(x * bn0s[0] + bn0b[0])
    ref = jnp.zeros((N, F), jnp.float32)
    for b, (s_, d_) in enumerate(edge_sets):
        ref = ref + _branch_ref(x0, jnp.asarray(s_), jnp.asarray(d_), branch_params[b], N)
    ref = jax.block_until_ready(ref)

    assert out.shape == (N, F)
    assert jnp.allclose(out, ref, atol=1e-4, rtol=1e-4), (
        f"max abs err {jnp.max(jnp.abs(out - ref))}")
    print("KERNEL_OK")
</pallas_src>

<mosaic_0001>
module attributes {stable_mosaic.version = 11 : i64} {
  func.func @spellb_kernel(%arg0: i32, %arg1: memref<16x8xf32, #tpu.memory_space<vmem>>, %arg2: memref<2x8xf32, #tpu.memory_space<vmem>>, %arg3: memref<1x16x16xf32, #tpu.memory_space<vmem>>, %arg4: memref<1x8x16xf32, #tpu.memory_space<vmem>>, %arg5: memref<1x8x16xf32, #tpu.memory_space<vmem>>, %arg6: memref<1x32x16xf32, #tpu.memory_space<vmem>>, %arg7: memref<1x32x8xf32, #tpu.memory_space<vmem>>, %arg8: memref<1x10x16xf32, #tpu.memory_space<vmem>>, %arg9: memref<1x16x8xf32, #tpu.memory_space<vmem>>) attributes {dimension_semantics = [#tpu.dimension_semantics<parallel>], iteration_bounds = array<i64: 3>, scalar_prefetch = 0 : i64, scratch_operands = 0 : i64, tpu.core_type = #tpu.core_type<tc>, window_params = [{pipeline_mode = #tpu.pipeline_mode<synchronous>, transform_indices = @transform_0, window_bounds = array<i64: 16, 8>}, {pipeline_mode = #tpu.pipeline_mode<synchronous>, transform_indices = @transform_1, window_bounds = array<i64: 2, 8>}, {transform_indices = @transform_2, window_bounds = array<i64: 1, 16, 16>}, {transform_indices = @transform_3, window_bounds = array<i64: 1, 8, 16>}, {transform_indices = @transform_4, window_bounds = array<i64: 1, 8, 16>}, {transform_indices = @transform_5, window_bounds = array<i64: 1, 32, 16>}, {transform_indices = @transform_6, window_bounds = array<i64: 1, 32, 8>}, {transform_indices = @transform_7, window_bounds = array<i64: 1, 10, 16>}, {transform_indices = @transform_8, window_bounds = array<i64: 1, 16, 8>}]} {
    %c0 = arith.constant 0 : index
    %c0_0 = arith.constant 0 : index
    %c0_1 = arith.constant 0 : index
    %0 = vector.load %arg8[%c0, %c0_0, %c0_1] : memref<1x10x16xf32, #tpu.memory_space<vmem>>, vector<1x10x16xf32>
    %1 = vector.shape_cast %0 : vector<1x10x16xf32> to vector<10x16xf32>
    %2 = vector.extract_strided_slice %1 {offsets = [0, 0], sizes = [1, 8], strides = [1, 1]} : vector<10x16xf32> to vector<1x8xf32>
    %3 = vector.extract_strided_slice %1 {offsets = [1, 0], sizes = [1, 16], strides = [1, 1]} : vector<10x16xf32> to vector<1x16xf32>
    %4 = vector.extract_strided_slice %1 {offsets = [2, 0], sizes = [1, 16], strides = [1, 1]} : vector<10x16xf32> to vector<1x16xf32>
    %5 = vector.extract_strided_slice %1 {offsets = [3, 0], sizes = [1, 16], strides = [1, 1]} : vector<10x16xf32> to vector<1x16xf32>
    %6 = vector.extract_strided_slice %1 {offsets = [4, 0], sizes = [1, 16], strides = [1, 1]} : vector<10x16xf32> to vector<1x16xf32>
    %7 = vector.extract_strided_slice %1 {offsets = [5, 0], sizes = [1, 16], strides = [1, 1]} : vector<10x16xf32> to vector<1x16xf32>
    %8 = vector.extract_strided_slice %1 {offsets = [6, 0], sizes = [1, 16], strides = [1, 1]} : vector<10x16xf32> to vector<1x16xf32>
    %9 = vector.extract_strided_slice %1 {offsets = [7, 0], sizes = [1, 8], strides = [1, 1]} : vector<10x16xf32> to vector<1x8xf32>
    %10 = vector.extract_strided_slice %1 {offsets = [8, 0], sizes = [1, 8], strides = [1, 1]} : vector<10x16xf32> to vector<1x8xf32>
    %11 = vector.extract_strided_slice %1 {offsets = [9, 0], sizes = [1, 8], strides = [1, 1]} : vector<10x16xf32> to vector<1x8xf32>
    %c0_2 = arith.constant 0 : index
    %c0_3 = arith.constant 0 : index
    %12 = vector.load %arg2[%c0_2, %c0_3] : memref<2x8xf32, #tpu.memory_space<vmem>>, vector<2x8xf32>
    %c0_4 = arith.constant 0 : index
    %c0_5 = arith.constant 0 : index
    %13 = vector.load %arg1[%c0_4, %c0_5] : memref<16x8xf32, #tpu.memory_space<vmem>>, vector<16x8xf32>
    %14 = vector.extract_strided_slice %12 {offsets = [0, 0], sizes = [1, 8], strides = [1, 1]} : vector<2x8xf32> to vector<1x8xf32>
    %15 = vector.broadcast %14 : vector<1x8xf32> to vector<16x8xf32>
    %16 = arith.mulf %13, %15 : vector<16x8xf32>
    %17 = vector.extract_strided_slice %12 {offsets = [1, 0], sizes = [1, 8], strides = [1, 1]} : vector<2x8xf32> to vector<1x8xf32>
    %18 = vector.broadcast %17 : vector<1x8xf32> to vector<16x8xf32>
    %19 = arith.addf %16, %18 : vector<16x8xf32>
    %cst = arith.constant 0.000000e+00 : f32
    %20 = vector.broadcast %cst : f32 to vector<16x8xf32>
    %21 = arith.maximumf %19, %20 : vector<16x8xf32>
    %c0_6 = arith.constant 0 : index
    %c0_7 = arith.constant 0 : index
    %c0_8 = arith.constant 0 : index
    %22 = vector.load %arg3[%c0_6, %c0_7, %c0_8] : memref<1x16x16xf32, #tpu.memory_space<vmem>>, vector<1x16x16xf32>
    %23 = vector.shape_cast %22 : vector<1x16x16xf32> to vector<16x16xf32>
    %cst_9 = arith.constant dense<0.000000e+00> : vector<16xf32>
    %24 = vector.multi_reduction <add>, %23, %cst_9 [1] : vector<16x16xf32> to vector<16xf32>
    %25 = vector.shape_cast %24 : vector<16xf32> to vector<16x1xf32>
    %cst_10 = arith.constant 0.000000e+00 : f32
    %26 = vector.broadcast %cst_10 : f32 to vector<16x1xf32>
    %27 = arith.cmpf ogt, %25, %26 : vector<16x1xf32>
    %cst_11 = arith.constant 1.000000e+00 : f32
    %28 = vector.broadcast %cst_11 : f32 to vector<16x1xf32>
    %29 = arith.maximumf %25, %28 : vector<16x1xf32>
    %30 = tpu.reciprocal %29 : vector<16x1xf32> -> vector<16x1xf32>
    %c0_12 = arith.constant 0 : index
    %c0_13 = arith.constant 0 : index
    %c0_14 = arith.constant 0 : index
    %31 = vector.load %arg4[%c0_12, %c0_13, %c0_14] : memref<1x8x16xf32, #tpu.memory_space<vmem>>, vector<1x8x16xf32>
    %32 = vector.shape_cast %31 : vector<1x8x16xf32> to vector<8x16xf32>
    %cst_15 = arith.constant dense<0.000000e+00> : vector<16x16xf32>
    %33 = tpu.matmul %21, %32, %cst_15 {dimension_numbers = #tpu.dot_dimension_numbers<[1], [0], [0], [1], [0, 0, 1, 1], [], []>} : vector<16x8xf32>, vector<8x16xf32>, vector<16x16xf32> -> vector<16x16xf32>
    %34 = vector.extract_strided_slice %33 {offsets = [0, 0], sizes = [16, 8], strides = [1, 1]} : vector<16x16xf32> to vector<16x8xf32>
    %35 = vector.extract_strided_slice %33 {offsets = [0, 8], sizes = [16, 8], strides = [1, 1]} : vector<16x16xf32> to vector<16x8xf32>
    %36 = arith.subf %34, %35 : vector<16x8xf32>
    %37 = vector.broadcast %2 : vector<1x8xf32> to vector<16x8xf32>
    %38 = arith.addf %36, %37 : vector<16x8xf32>
    %c0_16 = arith.constant 0 : index
    %c0_17 = arith.constant 0 : index
    %c0_18 = arith.constant 0 : index
    %39 = vector.load %arg5[%c0_16, %c0_17, %c0_18] : memref<1x8x16xf32, #tpu.memory_space<vmem>>, vector<1x8x16xf32>
    %40 = vector.shape_cast %39 : vector<1x8x16xf32> to vector<8x16xf32>
    %cst_19 = arith.constant -1.000000e+30 : f32
    %41 = vector.broadcast %cst_19 : f32 to vector<16x16xf32>
    %42 = vector.shape_cast %38 : vector<16x8xf32> to vector<16x1x8xf32>
    %43 = vector.shape_cast %35 : vector<16x8xf32> to vector<1x16x8xf32>
    %44 = vector.broadcast %42 : vector<16x1x8xf32> to vector<16x16x8xf32>
    %45 = vector.broadcast %43 : vector<1x16x8xf32> to vector<16x16x8xf32>
    %46 = arith.addf %44, %45 : vector<16x16x8xf32>
    %cst_20 = arith.constant 0.000000e+00 : f32
    %47 = vector.broadcast %cst_20 : f32 to vector<16x16x8xf32>
    %48 = arith.maximumf %46, %47 : vector<16x16x8xf32>
    %49 = vector.shape_cast %48 : vector<16x16x8xf32> to vector<256x8xf32>
    %cst_21 = arith.constant dense<0.000000e+00> : vector<256x16xf32>
    %50 = tpu.matmul %49, %40, %cst_21 {dimension_numbers = #tpu.dot_dimension_numbers<[1], [0], [0], [1], [0, 0, 1, 1], [], []>} : vector<256x8xf32>, vector<8x16xf32>, vector<256x16xf32> -> vector<256x16xf32>
    %51 = vector.shape_cast %50 : vector<256x16xf32> to vector<16x16x16xf32>
    %52 = vector.shape_cast %23 : vector<16x16xf32> to vector<16x16x1xf32>
    %cst_22 = arith.constant 0.000000e+00 : f32
    %53 = vector.broadcast %cst_22 : f32 to vector<16x16x1xf32>
    %54 = arith.cmpf ogt, %52, %53 : vector<16x16x1xf32>
    %cst_23 = arith.constant -1.000000e+30 : f32
    %55 = vector.shape_cast %54 : vector<16x16x1xi1> to vector<16x16x1xi1>
    %56 = vector.broadcast %55 : vector<16x16x1xi1> to vector<16x16x16xi1>
    %57 = vector.broadcast %cst_23 : f32 to vector<16x16x16xf32>
    %58 = arith.select %56, %51, %57 : vector<16x16x16xi1>, vector<16x16x16xf32>
    %cst_24 = arith.constant dense<0xFF800000> : vector<16x16xf32>
    %59 = vector.multi_reduction <maximumf>, %58, %cst_24 [1] : vector<16x16x16xf32> to vector<16x16xf32>
    %60 = arith.maximumf %41, %59 : vector<16x16xf32>
    %61 = vector.broadcast %3 : vector<1x16xf32> to vector<16x16xf32>
    %62 = arith.addf %60, %61 : vector<16x16xf32>
    %cst_25 = arith.constant 0.000000e+00 : f32
    %63 = vector.shape_cast %27 : vector<16x1xi1> to vector<16x1xi1>
    %64 = vector.broadcast %63 : vector<16x1xi1> to vector<16x16xi1>
    %65 = vector.broadcast %cst_25 : f32 to vector<16x16xf32>
    %66 = arith.select %64, %62, %65 : vector<16x16xi1>, vector<16x16xf32>
    %67 = vector.broadcast %4 : vector<1x16xf32> to vector<16x16xf32>
    %68 = arith.mulf %66, %67 : vector<16x16xf32>
    %69 = vector.broadcast %5 : vector<1x16xf32> to vector<16x16xf32>
    %70 = arith.addf %68, %69 : vector<16x16xf32>
    %cst_26 = arith.constant 0.000000e+00 : f32
    %71 = vector.broadcast %cst_26 : f32 to vector<16x16xf32>
    %72 = arith.maximumf %70, %71 : vector<16x16xf32>
    %cst_27 = arith.constant dense<0.000000e+00> : vector<16x16xf32>
    %73 = tpu.matmul %23, %72, %cst_27 {dimension_numbers = #tpu.dot_dimension_numbers<[1], [0], [0], [1], [0, 0, 1, 1], [], []>} : vector<16x16xf32>, vector<16x16xf32>, vector<16x16xf32> -> vector<16x16xf32>
    %74 = vector.broadcast %30 : vector<16x1xf32> to vector<16x16xf32>
    %75 = arith.mulf %73, %74 : vector<16x16xf32>
    %76 = tpu.concatenate %75, %72 in 1 : vector<16x16xf32>, vector<16x16xf32> -> vector<16x32xf32>
    %c0_28 = arith.constant 0 : index
    %c0_29 = arith.constant 0 : index
    %c0_30 = arith.constant 0 : index
    %77 = vector.load %arg6[%c0_28, %c0_29, %c0_30] : memref<1x32x16xf32, #tpu.memory_space<vmem>>, vector<1x32x16xf32>
    %78 = vector.shape_cast %77 : vector<1x32x16xf32> to vector<32x16xf32>
    %cst_31 = arith.constant dense<0.000000e+00> : vector<16x16xf32>
    %79 = tpu.matmul %76, %78, %cst_31 {dimension_numbers = #tpu.dot_dimension_numbers<[1], [0], [0], [1], [0, 0, 1, 1], [], []>} : vector<16x32xf32>, vector<32x16xf32>, vector<16x16xf32> -> vector<16x16xf32>
    %80 = vector.broadcast %6 : vector<1x16xf32> to vector<16x16xf32>
    %81 = arith.addf %79, %80 : vector<16x16xf32>
    %82 = vector.broadcast %7 : vector<1x16xf32> to vector<16x16xf32>
    %83 = arith.mulf %81, %82 : vector<16x16xf32>
    %84 = vector.broadcast %8 : vector<1x16xf32> to vector<16x16xf32>
    %85 = arith.addf %83, %84 : vector<16x16xf32>
    %cst_32 = arith.constant 0.000000e+00 : f32
    %86 = vector.broadcast %cst_32 : f32 to vector<16x16xf32>
    %87 = arith.maximumf %85, %86 : vector<16x16xf32>
    %cst_33 = arith.constant dense<0.000000e+00> : vector<16x16xf32>
    %88 = tpu.matmul %23, %87, %cst_33 {dimension_numbers = #tpu.dot_dimension_numbers<[1], [0], [0], [1], [0, 0, 1, 1], [], []>} : vector<16x16xf32>, vector<16x16xf32>, vector<16x16xf32> -> vector<16x16xf32>
    %89 = vector.broadcast %30 : vector<16x1xf32> to vector<16x16xf32>
    %90 = arith.mulf %88, %89 : vector<16x16xf32>
    %91 = tpu.concatenate %90, %87 in 1 : vector<16x16xf32>, vector<16x16xf32> -> vector<16x32xf32>
    %c0_34 = arith.constant 0 : index
    %c0_35 = arith.constant 0 : index
    %c0_36 = arith.constant 0 : index
    %92 = vector.load %arg7[%c0_34, %c0_35, %c0_36] : memref<1x32x8xf32, #tpu.memory_space<vmem>>, vector<1x32x8xf32>
    %93 = vector.shape_cast %92 : vector<1x32x8xf32> to vector<32x8xf32>
    %cst_37 = arith.constant dense<0.000000e+00> : vector<16x8xf32>
    %94 = tpu.matmul %91, %93, %cst_37 {dimension_numbers = #tpu.dot_dimension_numbers<[1], [0], [0], [1], [0, 0, 1, 1], [], []>} : vector<16x32xf32>, vector<32x8xf32>, vector<16x8xf32> -> vector<16x8xf32>
    %95 = vector.broadcast %9 : vector<1x8xf32> to vector<16x8xf32>
    %96 = arith.addf %94, %95 : vector<16x8xf32>
    %97 = vector.broadcast %10 : vector<1x8xf32> to vector<16x8xf32>
    %98 = arith.mulf %96, %97 : vector<16x8xf32>
    %99 = vector.broadcast %11 : vector<1x8xf32> to vector<16x8xf32>
    %100 = arith.addf %98, %99 : vector<16x8xf32>
    %c0_38 = arith.constant 0 : index
    %c0_39 = arith.constant 0 : index
    %c0_40 = arith.constant 0 : index
    %101 = vector.load %arg9[%c0_38, %c0_39, %c0_40] : memref<1x16x8xf32, #tpu.memory_space<vmem>>, vector<1x16x8xf32>
    %102 = vector.shape_cast %101 : vector<1x16x8xf32> to vector<16x8xf32>
    %103 = vector.shape_cast %100 : vector<16x8xf32> to vector<1x16x8xf32>
    tpu.vector_store %arg9[%c0_38, %c0_39, %c0_40], %103 {strides = array<i32>} : memref<1x16x8xf32, #tpu.memory_space<vmem>>, vector<1x16x8xf32>,
    return
  }
  func.func @transform_0(%arg0: i32) -> (i32, i32) {
    %c0_i32 = arith.constant 0 : i32
    %c0_i32_0 = arith.constant 0 : i32
    %c0_i32_1 = arith.constant 0 : i32
    return %c0_i32, %c0_i32_0 : i32, i32
  }
  func.func @transform_1(%arg0: i32) -> (i32, i32) {
    %c0_i32 = arith.constant 0 : i32
    %c0_i32_0 = arith.constant 0 : i32
    %c0_i32_1 = arith.constant 0 : i32
    return %c0_i32, %c0_i32_0 : i32, i32
  }
  func.func @transform_2(%arg0: i32) -> (i32, i32, i32) {
    %c0_i32 = arith.constant 0 : i32
    %c0_i32_0 = arith.constant 0 : i32
    %c0_i32_1 = arith.constant 0 : i32
    return %arg0, %c0_i32, %c0_i32_0 : i32, i32, i32
  }
  func.func @transform_3(%arg0: i32) -> (i32, i32, i32) {
    %c0_i32 = arith.constant 0 : i32
    %c0_i32_0 = arith.constant 0 : i32
    %c0_i32_1 = arith.constant 0 : i32
    return %arg0, %c0_i32, %c0_i32_0 : i32, i32, i32
  }
  func.func @transform_4(%arg0: i32) -> (i32, i32, i32) {
    %c0_i32 = arith.constant 0 : i32
    %c0_i32_0 = arith.constant 0 : i32
    %c0_i32_1 = arith.constant 0 : i32
    return %arg0, %c0_i32, %c0_i32_0 : i32, i32, i32
  }
  func.func @transform_5(%arg0: i32) -> (i32, i32, i32) {
    %c0_i32 = arith.constant 0 : i32
    %c0_i32_0 = arith.constant 0 : i32
    %c0_i32_1 = arith.constant 0 : i32
    return %arg0, %c0_i32, %c0_i32_0 : i32, i32, i32
  }
  func.func @transform_6(%arg0: i32) -> (i32, i32, i32) {
    %c0_i32 = arith.constant 0 : i32
    %c0_i32_0 = arith.constant 0 : i32
    %c0_i32_1 = arith.constant 0 : i32
    return %arg0, %c0_i32, %c0_i32_0 : i32, i32, i32
  }
  func.func @transform_7(%arg0: i32) -> (i32, i32, i32) {
    %c0_i32 = arith.constant 0 : i32
    %c0_i32_0 = arith.constant 0 : i32
    %c0_i32_1 = arith.constant 0 : i32
    return %arg0, %c0_i32, %c0_i32_0 : i32, i32, i32
  }
  func.func @transform_8(%arg0: i32) -> (i32, i32, i32) {
    %c0_i32 = arith.constant 0 : i32
    %c0_i32_0 = arith.constant 0 : i32
    %c0_i32_1 = arith.constant 0 : i32
    return %arg0, %c0_i32, %c0_i32_0 : i32, i32, i32
  }
}

</mosaic_0001>

<bundles_post_ra>
// kernel: tpu_custom_call.1
= control target key start
LH: loop header
LB: loop body
LE: loop exit
PB: predicated region body
PF: predicated region fallthrough
CT: control target
= control target key end

     0   :  { %s2471_s27 = smov 0   ;;  %s2979_s0 = inlined_call_operand.vmem [shape: f32[16,8], index: 0, kind: input, shape index: {}]   ;;  %s2980_s1 = inlined_call_operand.vmem [shape: f32[2,8], index: 1, kind: input, shape index: {}]   ;;  %s2981_s2 = inlined_call_operand.vmem [shape: f32[3,16,16], index: 2, kind: input, shape index: {}]   ;;  %s2982_s3 = inlined_call_operand.vmem [shape: f32[3,8,16], index: 3, kind: input, shape index: {}]   ;;  %s2983_s4 = inlined_call_operand.vmem [shape: f32[3,8,16], index: 4, kind: input, shape index: {}]   ;;  %s2984_s5 = inlined_call_operand.vmem [shape: f32[3,32,16], index: 5, kind: input, shape index: {}]   ;;  %s2985_s6 = inlined_call_operand.vmem [shape: f32[3,32,8], index: 6, kind: input, shape index: {}]   ;;  %s2986_s7 = inlined_call_operand.vmem [shape: f32[3,10,16], index: 7, kind: input, shape index: {}]   ;;  %s2987_s8 = inlined_call_operand.vmem [shape: f32[3,16,8], index: 8, kind: output, shape index: {}]  }
   0x1 LB: > { %s2158_s28 = sadd.s32 4294967295, %s2421_s27   ;;  %p2162_p0 = scmp.ge.s32.totalorder %s2421_s27, 1  ;;  %s2421_s27 = sphi %s2471_s27, %s18_s27  }
   0x2   : > { %p310_p1 = scmp.lt.s32.totalorder %s2421_s27, 4 }
   0x4   : > { %p311_p2 = pnand %p2162_p0, %p310_p1 }
   0x5   : > { %p367_p3 = scmp.lt.s32.totalorder (!%p311_p2), %s2158_s28, 2  ;;  %v405_v0 = vlaneseq (!%p311_p2)  ;;  %v402_v2 = vld [vmem:[%s2980_s1] sm:$0x3] (!%p311_p2)  ;;  %v404_v6 = vld [vmem:[%s2979_s0 + $0x8] sm:$0xff] (!%p311_p2)  ;;  %vm435_vm0 = vcmask (!%p311_p2), 64512   ;;  %s2423_s20 = smov (!%p311_p2), 120  }
   0x6   : > { %314 = sbr.rel (%p311_p2) target bundleno = 1553 (0x611), region = 52  ;;  %v403_v5 = vld [vmem:[%s2979_s0] sm:$0xff] (!%p311_p2)  ;;  %v2424_v43 = vmov (!%p311_p2), 1966171168   ;;  %vm421_vm1 = vcmask (!%p311_p2), 130048   ;;  %s2425_s30 = smov (!%p311_p2), 16  }
   0x7   : > { %v2481_v1 = vshrl.u32 (!%p311_p2), %v405_v0, 7  ;;  %v538_v44 = vunpack.c.l.s4 (!%p311_p2), %v2424_v43 }
   0x9   : > { %v2488_v3 = vsub.s32 (!%p311_p2), 0, %v2481_v1  ;;  %v2491_v4 = vsub.s32 (!%p311_p2), 1, %v2481_v1  ;;  %v2533_v22 = vsub.s32 (!%p311_p2), 2, %v2481_v1  ;;  %v2542_v26 = vsub.s32 (!%p311_p2), 3, %v2481_v1 }
   0xa   : > { %v2553_v31 = vsub.s32 (!%p311_p2), 4, %v2481_v1  ;;  %v2560_v34 = vsub.s32 (!%p311_p2), 5, %v2481_v1  ;;  %v2567_v37 = vsub.s32 (!%p311_p2), 6, %v2481_v1  ;;  %v2574_v40 = vsub.s32 (!%p311_p2), 7, %v2481_v1 }
   0xb   : > { %v408_v8 = vrot.slane (!%p311_p2), %v402_v2, %v2488_v3  ;;  %v414_v9 = vrot.slane (!%p311_p2), %v402_v2, %v2491_v4  ;;  %v539_v46 = vunpack.c.0.s8 (!%p311_p2), %v538_v44 }
   0xd   : > { %s2989_s28 = smov (!%p367_p3, %s2158_s28), 2  ;;  %v409_v11 = vmul.f32 %v408_v8, %v403_v5  ;;  %v410_v12 = vmul.f32 %v408_v8, %v404_v6  ;;  %v2598_v51 = vsub.s32 %v539_v46, %v2481_v1 }
   0xe   : > { %s2165_s9 = sshll.u32 %s2989_s28, 3  ;;  %s2516_s21 = sshll.u32 %s2989_s28, 4 }
   0xf   : > { %s375_s12 = scalar_lea.vmem %s2982_s3, %s2165_s9  ;;  %s379_s19 = scalar_lea.vmem %s2983_s4, %s2165_s9  ;;  %v415_v13 = vadd.f32 %v414_v9, %v409_v11  ;;  %v416_v14 = vadd.f32 %v414_v9, %v410_v12 }
  0x10   : > { %v434_v7 = vld [vmem:[%s375_s12] sm:$0xff]  ;;  %s2522_s24 = scalar_lea.vmem %s2981_s2, %s2516_s21  ;;  %s2584_s29 = scalar_lea.vmem %s2986_s7, %s2516_s21 }
  0x11   : > { %2280 = vmatprep.subr.mxu0 %v434_v7  ;;  %v533_v10 = vld [vmem:[%s379_s19] sm:$0xff]  ;;  %v417_v15 = vmax.f32 %v415_v13, 0.0  ;;  %v418_v16 = vmax.f32 %v416_v14, 0.0  ;;  %v2525_v19 = vld [vmem:[%s2522_s24 + $0x8] sm:$0xff]  ;;  %s2220_s9 = sshll.u32 %s2989_s28, 5  ;;  %s399_s17 = scalar_lea.vmem %s2987_s8, %s2516_s21 }
  0x12   : > { %2281 = vmatpush3.msra.mxu0 %v434_v7  ;;  %2395 = vmatprep.subr.mxu1 %v533_v10  ;;  %v1201_v20 = vrot.slane %v2525_v19, %v2491_v4  ;;  %v2530_v21 = vld [vmem:[%s2522_s24] sm:$0xff]  ;;  %v1212_v24 = vrot.slane %v2525_v19, %v2533_v22  ;;  %v1190_v29 = vrot.slane %v2525_v19, %v2488_v3  ;;  %s384_s12 = scalar_lea.vmem %s2984_s5, %s2220_s9  ;;  %s389_s15 = scalar_lea.vmem %s2985_s6, %s2220_s9 }
  0x13   : > { %2285 = vmatprep.subr.mxu0 %v533_v10  ;;  %2396 = vmatpush3.msra.mxu1 %v533_v10  ;;  %v1124_v23 = vrot.slane %v2530_v21, %v2533_v22  ;;  %v1102_v25 = vrot.slane %v2530_v21, %v2488_v3  ;;  %v1113_v27 = vrot.slane %v2530_v21, %v2491_v4  ;;  %v2587_v45 = vld [vmem:[%s2584_s29] sm:$0xff]  ;;  %v422_v48 = vsel %vm421_vm1, %v2530_v21, 0.0 }
  0x14   : > { %2282 = vmatprep.mubr.msk.f32.mxu0 %vm435_vm0, %v417_v15  ;;  %v1135_v28 = vrot.slane %v2530_v21, %v2542_v26  ;;  %v1223_v30 = vrot.slane %v2525_v19, %v2542_v26  ;;  %v1146_v32 = vrot.slane %v2530_v21, %v2553_v31  ;;  %v1234_v33 = vrot.slane %v2525_v19, %v2553_v31 }
  0x15   : > { %2283 = vmatmul.mubr.msk.f32.vlgmr.msra.gmra.mrb[0].mxu0 %vm435_vm0, %v418_v16  ;;  %1115 = vbcast.lane.b32.xlu1 %v1113_v27, 256  ;;  %v1157_v35 = vrot.slane %v2530_v21, %v2560_v34  ;;  %v1245_v36 = vrot.slane %v2525_v19, %v2560_v34  ;;  %v1168_v38 = vrot.slane %v2530_v21, %v2567_v37 }
  0x16   : > { %2286 = vmatpush3.msra.mxu0 %v533_v10  ;;  %v1256_v39 = vrot.slane %v2525_v19, %v2567_v37  ;;  %v1179_v41 = vrot.slane %v2530_v21, %v2574_v40  ;;  %v1267_v42 = vrot.slane %v2525_v19, %v2574_v40  ;;  %v530_v47 = vrot.slane %v2587_v45, %v2488_v3 }
  0x19   : > { %1119 = vbcast.lane.b32.xlu1 %v1113_v27, 264 }
  0x1d   : > { %1207 = vbcast.lane.b32.xlu1 %v1201_v20, 264 }
  0x21   : > { %1130 = vbcast.lane.b32.xlu1 %v1124_v23, 264 }
  0x25   : > { %1218 = vbcast.lane.b32.xlu1 %v1212_v24, 264 }
  0x29   : > { %1108 = vbcast.lane.b32.xlu1 %v1102_v25, 264 }
  0x2d   : > { %1141 = vbcast.lane.b32.xlu1 %v1135_v28, 264 }
  0x31   : > { %1196 = vbcast.lane.b32.xlu1 %v1190_v29, 264 }
  0x35   : > { %1229 = vbcast.lane.b32.xlu1 %v1223_v30, 264 }
  0x39   : > { %1152 = vbcast.lane.b32.xlu1 %v1146_v32, 264 }
  0x3d   : > { %1240 = vbcast.lane.b32.xlu1 %v1234_v33, 264 }
  0x41   : > { %1163 = vbcast.lane.b32.xlu1 %v1157_v35, 264 }
  0x45   : > { %1251 = vbcast.lane.b32.xlu1 %v1245_v36, 264 }
  0x49   : > { %1174 = vbcast.lane.b32.xlu1 %v1168_v38, 264 }
  0x4d   : > { %1262 = vbcast.lane.b32.xlu1 %v1256_v39, 264 }
  0x51   : > { %1185 = vbcast.lane.b32.xlu1 %v1179_v41, 264 }
  0x55   : > { %1273 = vbcast.lane.b32.xlu1 %v1267_v42, 264 }
  0xe8   : > { %v2509_v17 = vpop.f32.mrb[0].mxu0 }
  0xe9   : > { %v2511_v18 = vpop.f32.mrb[1].mxu0 }
  0xea   : > { %519 = vrot.lane.b32.xlu0 %v2511_v18, %s2423_s20 }
  0xee   : > { %521 = vrot.lane.b32.xlu0 %v2509_v17, %s2423_s20 }
  0xf2   : > { %1203 = vbcast.lane.b32.xlu0 %v1201_v20, 256 }
  0xf6   : > { %1126 = vbcast.lane.b32.xlu0 %v1124_v23, 256 }
  0xfa   : > { %1214 = vbcast.lane.b32.xlu0 %v1212_v24, 256 }
  0xfe   : > { %1104 = vbcast.lane.b32.xlu0 %v1102_v25, 256 }
 0x102   : > { %1137 = vbcast.lane.b32.xlu0 %v1135_v28, 256 }
 0x106   : > { %1192 = vbcast.lane.b32.xlu0 %v1190_v29, 256 }
 0x10a   : > { %1225 = vbcast.lane.b32.xlu0 %v1223_v30, 256 }
 0x10e   : > { %1148 = vbcast.lane.b32.xlu0 %v1146_v32, 256 }
 0x112   : > { %1236 = vbcast.lane.b32.xlu0 %v1234_v33, 256 }
 0x116   : > { %1159 = vbcast.lane.b32.xlu0 %v1157_v35, 256 }
 0x11a   : > { %1247 = vbcast.lane.b32.xlu0 %v1245_v36, 256 }
 0x11e   : > { %1170 = vbcast.lane.b32.xlu0 %v1168_v38, 256 }
 0x122   : > { %1258 = vbcast.lane.b32.xlu0 %v1256_v39, 256 }
 0x126   : > { %1181 = vbcast.lane.b32.xlu0 %v1179_v41, 256 }
 0x12a   : > { %1269 = vbcast.lane.b32.xlu0 %v1267_v42, 256 }
 0x149   : > { %423 = vadd.xlane.f32.xlu0 %v422_v48 }
 0x15c   : > { %v2593_v49 = vpop.permute.xlu0 %519 }
 0x15d   : > { %v525_v50 = vsub.f32 %v2511_v18, %v2593_v49 }
 0x15f   : > { %v531_v52 = vadd.f32 %v530_v47, %v525_v50 }
 0x160   : > { %v2600_v53 = vpop.permute.xlu0 %521 }
 0x161   : > { %v543_v54 = vrot.slane %v531_v52, %v2598_v51  ;;  %v536_v55 = vcombine.high %v531_v52, %v531_v52  ;;  %v526_v56 = vsub.f32 %v2509_v17, %v2600_v53 }
 0x163   : > { %v559_v57 = vrot.slane %v543_v54, %v2598_v51  ;;  %v551_v58 = vcombine.high %v543_v54, %v543_v54  ;;  %v550_v59 = vrot.slane %v536_v55, %v2598_v51  ;;  %v2610_v1 = vadd.f32 %v530_v47, %v526_v56 }
 0x165   : > { %v637_v60 = vrot.slane %v559_v57, %v2488_v3  ;;  %v573_v61 = vrot.slane %v551_v58, %v2598_v51  ;;  %v552_v62 = vcombine.high %v550_v59, %v550_v59  ;;  %v566_v63 = vrot.slane %v550_v59, %v2598_v51 }
 0x166   : > { %v581_v0 = vcombine.high %v559_v57, %v559_v57  ;;  %v592_v20 = vrot.slane %v2610_v1, %v2598_v51 }
 0x167   : > { %v714_v2 = vadd.f32 %v637_v60, %v2593_v49  ;;  %v715_v5 = vadd.f32 %v637_v60, %v2600_v53  ;;  %v641_v6 = vrot.slane %v573_v61, %v2488_v3  ;;  %v582_v7 = vcombine.high %v566_v63, %v566_v63 }
 0x168   : > { %v653_v8 = vrot.slane %v566_v63, %v2488_v3  ;;  %v580_v9 = vrot.slane %v552_v62, %v2598_v51  ;;  %v645_v10 = vrot.slane %v581_v0, %v2488_v3  ;;  %v583_v11 = vcombine.high %v573_v61, %v573_v61 }
 0x169   : > { %v746_v12 = vmax.f32 %v714_v2, 0.0  ;;  %v747_v13 = vmax.f32 %v715_v5, 0.0  ;;  %v716_v14 = vadd.f32 %v641_v6, %v2593_v49  ;;  %v717_v15 = vadd.f32 %v641_v6, %v2600_v53 }
 0x16a   : > { %v722_v16 = vadd.f32 %v653_v8, %v2593_v49  ;;  %v723_v17 = vadd.f32 %v653_v8, %v2600_v53  ;;  %v657_v18 = vrot.slane %v580_v9, %v2488_v3  ;;  %v718_v24 = vadd.f32 %v645_v10, %v2593_v49 }
 0x16b   : > { %2287 = vmatprep.mubr.msk.f32.mxu0 %vm435_vm0, %v746_v12  ;;  %v748_v23 = vmax.f32 %v716_v14, 0.0  ;;  %v661_v25 = vrot.slane %v582_v7, %v2488_v3  ;;  %v749_v30 = vmax.f32 %v717_v15, 0.0  ;;  %v719_v33 = vadd.f32 %v645_v10, %v2600_v53 }
 0x16c   : > { %2288 = vmatmul.mubr.msk.f32.vlgmr.msra.gmra.mrb[2].mxu0 %vm435_vm0, %v747_v13  ;;  %v754_v27 = vmax.f32 %v722_v16, 0.0  ;;  %v755_v28 = vmax.f32 %v723_v17, 0.0  ;;  %v724_v29 = vadd.f32 %v657_v18, %v2593_v49  ;;  %v725_v32 = vadd.f32 %v657_v18, %v2600_v53 }
 0x16d   : > { %2290 = vmatprep.mubr.msk.f32.mxu0 %vm435_vm0, %v748_v23  ;;  %v649_v35 = vrot.slane %v583_v11, %v2488_v3  ;;  %v726_v38 = vadd.f32 %v661_v25, %v2593_v49  ;;  %v584_v39 = vcombine.high %v580_v9, %v580_v9  ;;  %v608_v41 = vrot.slane %v592_v20, %v2598_v51 }
 0x16e   : > { %2299 = vmatprep.mubr.msk.f32.mxu1 %vm435_vm0, %v754_v27  ;;  %v756_v36 = vmax.f32 %v724_v29, 0.0  ;;  %v750_v42 = vmax.f32 %v718_v24, 0.0  ;;  %v600_v46 = vcombine.high %v592_v20, %v592_v20  ;;  %v757_v47 = vmax.f32 %v725_v32, 0.0 }
 0x16f   : > { %2300 = vmatmul.mubr.msk.f32.vlgmr.msra.gmra.mrb[0].mxu1 %vm435_vm0, %v755_v28  ;;  %v720_v43 = vadd.f32 %v649_v35, %v2593_v49  ;;  %v665_v44 = vrot.slane %v584_v39, %v2488_v3  ;;  %v727_v48 = vadd.f32 %v661_v25, %v2600_v53  ;;  %v721_v50 = vadd.f32 %v649_v35, %v2600_v53 }
 0x170   : > { %2302 = vmatprep.mubr.msk.f32.mxu1 %vm435_vm0, %v756_v36  ;;  %2291 = vmatmul.mubr.msk.f32.gmra.mrb[4].mxu0 %vm435_vm0, %v749_v30  ;;  %v758_v52 = vmax.f32 %v726_v38, 0.0  ;;  %v751_v54 = vmax.f32 %v719_v33, 0.0  ;;  %v669_v56 = vrot.slane %v608_v41, %v2488_v3  ;;  %v622_v58 = vrot.slane %v600_v46, %v2598_v51 }
 0x171   : > { %2293 = vmatprep.mubr.msk.f32.mxu0 %vm435_vm0, %v750_v42  ;;  %v728_v55 = vadd.f32 %v665_v44, %v2593_v49  ;;  %v752_v57 = vmax.f32 %v720_v43, 0.0  ;;  %v759_v59 = vmax.f32 %v727_v48, 0.0  ;;  %v753_v60 = vmax.f32 %v721_v50, 0.0 }
 0x172   : > { %v729_v61 = vadd.f32 %v665_v44, %v2600_v53  ;;  %v585_v62 = vcombine.high %v2610_v1, %v2610_v1  ;;  %v730_v0 = vadd.f32 %v669_v56, %v2593_v49  ;;  %v673_v2 = vrot.slane %v622_v58, %v2488_v3 }
 0x173   : > { %2303 = vmatmul.mubr.msk.f32.gmra.mrb[2].mxu1 %vm435_vm0, %v757_v47  ;;  %v760_v63 = vmax.f32 %v728_v55, 0.0  ;;  %v630_v5 = vcombine.high %v608_v41, %v608_v41  ;;  %v425_v6 = vsel %vm421_vm1, %v2525_v19, 0.0  ;;  %v731_v8 = vadd.f32 %v669_v56, %v2600_v53 }
 0x174   : > { %2305 = vmatprep.mubr.msk.f32.mxu1 %vm435_vm0, %v758_v52  ;;  %2294 = vmatmul.mubr.msk.f32.gmra.mrb[6].mxu0 %vm435_vm0, %v751_v54  ;;  %v761_v7 = vmax.f32 %v729_v61, 0.0  ;;  %v599_v1 = vrot.slane %v585_v62, %v2598_v51  ;;  %v762_v9 = vmax.f32 %v730_v0, 0.0  ;;  %v732_v10 = vadd.f32 %v673_v2, %v2593_v49 }
 0x175   : > { %2296 = vmatprep.mubr.msk.f32.mxu0 %vm435_vm0, %v752_v57  ;;  %v677_v11 = vrot.slane %v630_v5, %v2488_v3  ;;  %v632_v12 = vcombine.high %v622_v58, %v622_v58  ;;  %426 = vadd.xlane.f32.xlu1 %v425_v6  ;;  %v763_v19 = vmax.f32 %v731_v8, 0.0  ;;  %v733_v13 = vadd.f32 %v673_v2, %v2600_v53 }
 0x176   : > { %v615_v14 = vrot.slane %v599_v1, %v2598_v51  ;;  %v764_v15 = vmax.f32 %v732_v10, 0.0  ;;  %v601_v17 = vcombine.high %v599_v1, %v599_v1 }
 0x177   : > { %2306 = vmatmul.mubr.msk.f32.gmra.mrb[4].mxu1 %vm435_vm0, %v759_v59  ;;  %v734_v16 = vadd.f32 %v677_v11, %v2593_v49  ;;  %v765_v18 = vmax.f32 %v733_v13, 0.0  ;;  %v735_v20 = vadd.f32 %v677_v11, %v2600_v53 }
 0x178   : > { %2308 = vmatprep.mubr.msk.f32.mxu1 %vm435_vm0, %v760_v63  ;;  %2297 = vmatmul.mubr.msk.f32.gmra.mrb[8].mxu0 %vm435_vm0, %v753_v60  ;;  %v685_v25 = vrot.slane %v615_v14, %v2488_v3  ;;  %v629_v27 = vrot.slane %v601_v17, %v2598_v51  ;;  %v631_v35 = vcombine.high %v615_v14, %v615_v14  ;;  %v1116_v60 = vpop.permute.xlu1 %1115 }
 0x179   : > { %2339 = vmatprep.mubr.msk.f32.mxu0 %vm421_vm1, %v2530_v21  ;;  %v681_v21 = vrot.slane %v632_v12, %v2488_v3  ;;  %v766_v23 = vmax.f32 %v734_v16, 0.0  ;;  %v767_v28 = vmax.f32 %v735_v20, 0.0  ;;  %vm1277_vm4 = vcmp.gt.f32.partialorder %v1116_v60, 0.0 }
 0x17a   : > { %v738_v32 = vadd.f32 %v685_v25, %v2593_v49  ;;  %v689_v33 = vrot.slane %v629_v27, %v2488_v3  ;;  %v739_v51 = vadd.f32 %v685_v25, %v2600_v53  ;;  %v693_v41 = vrot.slane %v631_v35, %v2488_v3 }
 0x17b   : > { %2309 = vmatmul.mubr.msk.f32.gmra.mrb[6].mxu1 %vm435_vm0, %v761_v7  ;;  %v736_v24 = vadd.f32 %v681_v21, %v2593_v49  ;;  %v737_v29 = vadd.f32 %v681_v21, %v2600_v53  ;;  %v633_v42 = vcombine.high %v629_v27, %v629_v27  ;;  %v2767_v60 = vrot.slane %v2587_v45, %v2533_v22 }
 0x17c   : > { %2311 = vmatprep.mubr.msk.f32.mxu1 %vm435_vm0, %v762_v9  ;;  %v770_v38 = vmax.f32 %v738_v32, 0.0  ;;  %v740_v39 = vadd.f32 %v689_v33, %v2593_v49  ;;  %v771_v43 = vmax.f32 %v739_v51, 0.0  ;;  %v741_v44 = vadd.f32 %v689_v33, %v2600_v53  ;;  %v1120_v61 = vpop.permute.xlu1 %1119 }
 0x17d   : > { %v768_v30 = vmax.f32 %v736_v24, 0.0  ;;  %v769_v36 = vmax.f32 %v737_v29, 0.0  ;;  %v742_v47 = vadd.f32 %v693_v41, %v2593_v49  ;;  %v697_v48 = vrot.slane %v633_v42, %v2488_v3 }
 0x17e   : > { %v772_v46 = vmax.f32 %v740_v39, 0.0  ;;  %v773_v50 = vmax.f32 %v741_v44, 0.0  ;;  %v743_v52 = vadd.f32 %v693_v41, %v2600_v53  ;;  %vm1278_vm6 = vcmp.gt.f32.partialorder %v1120_v61, 0.0 }
 0x17f   : > { %2312 = vmatmul.mubr.msk.f32.gmra.mrb[8].mxu1 %vm435_vm0, %v763_v19  ;;  %v774_v54 = vmax.f32 %v742_v47, 0.0  ;;  %v744_v55 = vadd.f32 %v697_v48, %v2593_v49  ;;  %v745_v57 = vadd.f32 %v697_v48, %v2600_v53  ;;  %v2707_v49 = vpop.permute.xlu0 %1203  ;;  %v2751_v39 = vrot.slane %v2587_v45, %v2491_v4 }
 0x180   : > { %2314 = vmatprep.mubr.msk.f32.mxu1 %vm435_vm0, %v764_v15  ;;  %v775_v56 = vmax.f32 %v743_v52, 0.0  ;;  %v2705_v62 = vpop.permute.xlu1 %1207 }
 0x181   : > { %v776_v58 = vmax.f32 %v744_v55, 0.0  ;;  %v777_v59 = vmax.f32 %v745_v57, 0.0 }
 0x183   : > { %2315 = vmatmul.mubr.msk.f32.gmra.mrb[10].mxu1 %vm435_vm0, %v765_v18  ;;  %v2711_v0 = vpop.permute.xlu0 %1126 }
 0x184   : > { %2317 = vmatprep.mubr.msk.f32.mxu1 %vm435_vm0, %v766_v23  ;;  %v2709_v63 = vpop.permute.xlu1 %1130  ;;  %vm1279_vm5 = vcmp.gt.f32.partialorder %v2711_v0, 0.0 }
 0x185   : > { %vm1280_vm7 = vcmp.gt.f32.partialorder %v2709_v63, 0.0  ;;  %v2782_v63 = vrot.slane %v2587_v45, %v2542_v26 }
 0x187   : > { %2318 = vmatmul.mubr.msk.f32.gmra.mrb[12].mxu1 %vm435_vm0, %v767_v28  ;;  %v2715_v53 = vpop.permute.xlu0 %1214 }
 0x188   : > { %2320 = vmatprep.mubr.msk.f32.mxu1 %vm435_vm0, %v768_v30  ;;  %v2713_v2 = vpop.permute.xlu1 %1218 }
 0x18b   : > { %2321 = vmatmul.mubr.msk.f32.gmra.mrb[14].mxu1 %vm435_vm0, %v769_v36  ;;  %v1105_v6 = vpop.permute.xlu0 %1104 }
 0x18c   : > { %2323 = vmatprep.mubr.msk.f32.mxu1 %vm435_vm0, %v770_v38  ;;  %v1109_v5 = vpop.permute.xlu1 %1108  ;;  %vm1275_vm3 = vcmp.gt.f32.partialorder %v1105_v6, 0.0 }
 0x18d   : > { %vm1276_vm2 = vcmp.gt.f32.partialorder %v1109_v5, 0.0 }
 0x18f   : > { %2324 = vmatmul.mubr.msk.f32.gmra.mrb[16].mxu1 %vm435_vm0, %v771_v43  ;;  %v2719_v8 = vpop.permute.xlu0 %1137 }
 0x190   : > { %2326 = vmatprep.mubr.msk.f32.mxu1 %vm435_vm0, %v772_v46  ;;  %v2717_v7 = vpop.permute.xlu1 %1141  ;;  %vm1281_vm15 = vcmp.gt.f32.partialorder %v2719_v8, 0.0 }
 0x191   : > { %vm1282_vm11 = vcmp.gt.f32.partialorder %v2717_v7, 0.0 }
 0x193   : > { %2327 = vmatmul.mubr.msk.f32.gmra.mrb[18].mxu1 %vm435_vm0, %v773_v50  ;;  %v2723_v9 = vpop.permute.xlu0 %1192 }
 0x194   : > { %2329 = vmatprep.mubr.msk.f32.mxu1 %vm435_vm0, %v774_v54  ;;  %v2721_v1 = vpop.permute.xlu1 %1196 }
 0x197   : > { %2330 = vmatmul.mubr.msk.f32.gmra.mrb[20].mxu1 %vm435_vm0, %v775_v56  ;;  %v2727_v11 = vpop.permute.xlu0 %1225 }
 0x198   : > { %2332 = vmatprep.mubr.msk.f32.mxu1 %vm435_vm0, %v776_v58  ;;  %v2725_v10 = vpop.permute.xlu1 %1229 }
 0x19b   : > { %2333 = vmatmul.mubr.msk.f32.gmra.mrb[22].mxu1 %vm435_vm0, %v777_v59  ;;  %v1149_v19 = vpop.permute.xlu0 %1148 }
 0x19c   : > { %v1153_v12 = vpop.permute.xlu1 %1152  ;;  %vm1283_vm9 = vcmp.gt.f32.partialorder %v1149_v19, 0.0 }
 0x19d   : > { %vm1284_vm8 = vcmp.gt.f32.partialorder %v1153_v12, 0.0 }
 0x19f   : > { %v2731_v14 = vpop.permute.xlu0 %1236 }
 0x1a0   : > { %v2729_v13 = vpop.permute.xlu1 %1240 }
 0x1a3   : > { %v1160_v16 = vpop.permute.xlu0 %1159 }
 0x1a4   : > { %v1164_v15 = vpop.permute.xlu1 %1163  ;;  %vm1285_vm10 = vcmp.gt.f32.partialorder %v1160_v16, 0.0 }
 0x1a5   : > { %vm1286_vm13 = vcmp.gt.f32.partialorder %v1164_v15, 0.0 }
 0x1a7   : > { %v2735_v17 = vpop.permute.xlu0 %1247 }
 0x1a8   : > { %v2733_v21 = vpop.permute.xlu1 %1251 }
 0x1ab   : > { %v2739_v20 = vpop.permute.xlu0 %1170 }
 0x1ac   : > { %v2737_v18 = vpop.permute.xlu1 %1174  ;;  %vm1287_vm12 = vcmp.gt.f32.partialorder %v2739_v20, 0.0 }
 0x1ad   : > { %vm1288_vm14 = vcmp.gt.f32.partialorder %v2737_v18, 0.0 }
 0x1af   : > { %v2747_v33 = vpop.permute.xlu0 %1258 }
 0x1b0   : > { %v2741_v24 = vpop.permute.xlu1 %1262 }
 0x1b4   : > { %v2761_v52 = vpop.permute.xlu1 %1185 }
 0x23f   : > { %v2289_v23 = vpop.f32.mrb[2].mxu0 }
 0x240   : > { %v1372_v25 = vsel %vm1276_vm2, %v2289_v23, -1e+30  ;;  %v940_v27 = vpop.f32.mrb[3].mxu0  ;;  %vm1290_vm2 = vcmp.gt.f32.partialorder %v2761_v52, 0.0 }
 0x241   : > { %v1404_v28 = vsel %vm421_vm1, %v1372_v25, -inf  ;;  %v1371_v29 = vsel %vm1275_vm3, %v940_v27, -1e+30 }
 0x242   : > { %v1403_v30 = vsel %vm421_vm1, %v1371_v29, -inf  ;;  %v2301_v32 = vpop.f32.mrb[0].mxu1 }
 0x243   : > { %v1405_v35 = vmax.f32 %v1403_v30, %v1404_v28  ;;  %v1380_v36 = vsel %vm1284_vm8, %v2301_v32, -1e+30  ;;  %v980_v51 = vpop.f32.mrb[1].mxu1  ;;  %v2292_v38 = vpop.f32.mrb[4].mxu0  ;;  %vm1293_vm8 = vcmp.gt.f32.partialorder %v2707_v49, 0.0 }
 0x244   : > { %v1440_v41 = vsel %vm421_vm1, %v1380_v36, -inf  ;;  %v1379_v42 = vsel %vm1283_vm9, %v980_v51, -1e+30  ;;  %v1374_v43 = vsel %vm1278_vm6, %v2292_v38, -1e+30  ;;  %v950_v44 = vpop.f32.mrb[5].mxu0  ;;  %v2774_v28 = vpop.permute.xlu0 %1181 }
 0x245   : > { %v1406_v46 = vrot.slane %v1405_v35, 4  ;;  %v1439_v47 = vsel %vm421_vm1, %v1379_v42, -inf  ;;  %v1413_v48 = vsel %vm421_vm1, %v1374_v43, -inf  ;;  %v1373_v50 = vsel %vm1277_vm4, %v950_v44, -1e+30 }
 0x246   : > { %v1441_v54 = vmax.f32 %v1439_v47, %v1440_v41  ;;  %v1412_v55 = vsel %vm421_vm1, %v1373_v50, -inf  ;;  %v2304_v56 = vpop.f32.mrb[2].mxu1  ;;  %vm1289_vm3 = vcmp.gt.f32.partialorder %v2774_v28, 0.0  ;;  %vm1292_vm4 = vcmp.gt.f32.partialorder %v2721_v1, 0.0 }
 0x247   : > { %v1407_v57 = vmax.f32 %v1405_v35, %v1406_v46  ;;  %v1414_v58 = vmax.f32 %v1412_v55, %v1413_v48  ;;  %v1382_v59 = vsel %vm1286_vm13, %v2304_v56, -1e+30  ;;  %v990_v61 = vpop.f32.mrb[3].mxu1  ;;  %v2295_v5 = vpop.f32.mrb[6].mxu0  ;;  %vm1291_vm6 = vcmp.gt.f32.partialorder %v2723_v9, 0.0 }
 0x248   : > { %v1442_v6 = vrot.slane %v1441_v54, 4  ;;  %v1449_v12 = vsel %vm421_vm1, %v1382_v59, -inf  ;;  %v1381_v19 = vsel %vm1285_vm10, %v990_v61, -1e+30  ;;  %v1376_v15 = vsel %vm1280_vm7, %v2295_v5, -1e+30 }
 0x249   : > { %v1408_v23 = vrot.slane %v1407_v57, 2  ;;  %v1415_v25 = vrot.slane %v1414_v58, 4  ;;  %v1448_v27 = vsel %vm421_vm1, %v1381_v19, -inf  ;;  %v1422_v29 = vsel %vm421_vm1, %v1376_v15, -inf  ;;  %v960_v30 = vpop.f32.mrb[7].mxu0 }
 0x24a   : > { %v1443_v22 = vmax.f32 %v1441_v54, %v1442_v6  ;;  %v1450_v32 = vmax.f32 %v1448_v27, %v1449_v12  ;;  %v1375_v16 = vsel %vm1279_vm5, %v960_v30, -1e+30  ;;  %v2307_v35 = vpop.f32.mrb[4].mxu1  ;;  %vm1604_vm5 = vcmask 1041409  }
 0x24b   : > { %v1409_v36 = vmax.f32 %v1407_v57, %v1408_v23  ;;  %v1416_v51 = vmax.f32 %v1414_v58, %v1415_v25  ;;  %v1421_v38 = vsel %vm421_vm1, %v1375_v16, -inf  ;;  %v1384_v41 = vsel %vm1288_vm14, %v2307_v35, -1e+30  ;;  %v1000_v42 = vpop.f32.mrb[5].mxu1  ;;  %v2298_v43 = vpop.f32.mrb[8].mxu0 }
 0x24c   : > { %v1444_v44 = vrot.slane %v1443_v22, 2  ;;  %v1451_v46 = vrot.slane %v1450_v32, 4  ;;  %v1423_v0 = vmax.f32 %v1421_v38, %v1422_v29  ;;  %v1458_v47 = vsel %vm421_vm1, %v1384_v41, -inf  ;;  %v970_v48 = vpop.f32.mrb[9].mxu0 }
 0x24d   : > { %v1410_v50 = vrot.slane %v1409_v36, 1  ;;  %v1417_v26 = vrot.slane %v1416_v51, 2  ;;  %v1383_v45 = vsel %vm1287_vm12, %v1000_v42, -1e+30  ;;  %v1378_v54 = vsel %vm1282_vm11, %v2298_v43, -1e+30 }
 0x24e   : > { %v1445_v18 = vmax.f32 %v1443_v22, %v1444_v44  ;;  %v1452_v55 = vmax.f32 %v1450_v32, %v1451_v46  ;;  %v1424_v56 = vrot.slane %v1423_v0, 4  ;;  %v1457_v57 = vsel %vm421_vm1, %v1383_v45, -inf  ;;  %v2310_v58 = vpop.f32.mrb[6].mxu1 }
 0x24f   : > { %v1411_v59 = vmax.f32 %v1409_v36, %v1410_v50  ;;  %v1418_v61 = vmax.f32 %v1416_v51, %v1417_v26  ;;  %v1459_v5 = vmax.f32 %v1457_v57, %v1458_v47  ;;  %v1431_v6 = vsel %vm421_vm1, %v1378_v54, -inf  ;;  %v1010_v12 = vpop.f32.mrb[7].mxu1 }
 0x250   : > { %v1446_v19 = vrot.slane %v1445_v18, 1  ;;  %v1453_v20 = vrot.slane %v1452_v55, 2  ;;  %v1425_v15 = vmax.f32 %v1423_v0, %v1424_v56  ;;  %v1377_v7 = vsel %vm1281_vm15, %v970_v48, -1e+30 }
 0x251   : > { %v1547_v23 = vmax.f32 %v1411_v59, -1e+30  ;;  %v1419_v25 = vrot.slane %v1418_v61, 1  ;;  %v1460_v27 = vrot.slane %v1459_v5, 4  ;;  %v1430_v29 = vsel %vm421_vm1, %v1377_v7, -inf }
 0x252   : > { %v1447_v30 = vmax.f32 %v1445_v18, %v1446_v19  ;;  %v1454_v22 = vmax.f32 %v1452_v55, %v1453_v20  ;;  %v1426_v32 = vrot.slane %v1425_v15, 2  ;;  %v1432_v16 = vmax.f32 %v1430_v29, %v1431_v6  ;;  %v2313_v35 = vpop.f32.mrb[8].mxu1 }
 0x253   : > { %v1567_v36 = vadd.f32 %v2751_v39, %v1547_v23  ;;  %v1420_v51 = vmax.f32 %v1418_v61, %v1419_v25  ;;  %v1461_v38 = vmax.f32 %v1459_v5, %v1460_v27  ;;  %v1386_v8 = vsel %vm1290_vm2, %v2310_v58, -1e+30  ;;  %v1020_v41 = vpop.f32.mrb[9].mxu1 }
 0x254   : > { %vm1294_vm7 = vcmp.gt.f32.partialorder %v2705_v62, 0.0  ;;  %v1551_v42 = vmax.f32 %v1447_v30, -1e+30  ;;  %v1455_v43 = vrot.slane %v1454_v22, 1  ;;  %v1427_v44 = vmax.f32 %v1425_v15, %v1426_v32 }
 0x255   : > { %v1433_v46 = vrot.slane %v1432_v16, 4  ;;  %v1548_v0 = vmax.f32 %v1420_v51, -1e+30  ;;  %v1462_v47 = vrot.slane %v1461_v38, 2  ;;  %v1467_v48 = vsel %vm421_vm1, %v1386_v8, -inf }
 0x256   : > { %v1385_v50 = vsel %vm1289_vm3, %v1010_v12, -1e+30  ;;  %vm1296_vm9 = vcmp.gt.f32.partialorder %v2713_v2, 0.0  ;;  %vm1295_vm10 = vcmp.gt.f32.partialorder %v2715_v53, 0.0  ;;  %v2811_v52 = vadd.f32 %v2751_v39, %v1551_v42  ;;  %v2316_v18 = vpop.f32.mrb[10].mxu1 }
 0x257   : > { %v1456_v26 = vmax.f32 %v1454_v22, %v1455_v43  ;;  %v1428_v45 = vrot.slane %v1427_v44, 1  ;;  %v1434_v54 = vmax.f32 %v1432_v16, %v1433_v46  ;;  %v1568_v55 = vadd.f32 %v2751_v39, %v1548_v0  ;;  %v1030_v58 = vpop.f32.mrb[11].mxu1 }
 0x258   : > { %v1463_v56 = vmax.f32 %v1461_v38, %v1462_v47  ;;  %v1466_v57 = vsel %vm421_vm1, %v1385_v50, -inf  ;;  %v1388_v28 = vsel %vm1292_vm4, %v2313_v35, -1e+30  ;;  %vm1298_vm11 = vcmp.gt.f32.partialorder %v2725_v10, 0.0 }
 0x259   : > { %vm1297_vm12 = vcmp.gt.f32.partialorder %v2727_v11, 0.0  ;;  %v1612_v59 = vrot.slane %v2811_v52, 4  ;;  %v1552_v61 = vmax.f32 %v1456_v26, -1e+30  ;;  %v1429_v5 = vmax.f32 %v1427_v44, %v1428_v45 }
 0x25a   : > { %v1435_v6 = vrot.slane %v1434_v54, 2  ;;  %v1603_v12 = vrot.slane %v1568_v55, 7  ;;  %v1464_v19 = vrot.slane %v1463_v56, 1  ;;  %v1468_v20 = vmax.f32 %v1466_v57, %v1467_v48  ;;  %v2319_v27 = vpop.f32.mrb[12].mxu1 }
 0x25b   : > { %v1476_v15 = vsel %vm421_vm1, %v1388_v28, -inf  ;;  %vm1300_vm13 = vcmp.gt.f32.partialorder %v2729_v13, 0.0  ;;  %v2823_v1 = vadd.f32 %v2751_v39, %v1552_v61  ;;  %v1549_v7 = vmax.f32 %v1429_v5, -1e+30  ;;  %v1040_v16 = vpop.f32.mrb[13].mxu1 }
 0x25c   : > { %v1436_v23 = vmax.f32 %v1434_v54, %v1435_v6  ;;  %v1387_v25 = vsel %vm1291_vm6, %v1020_v41, -1e+30  ;;  %v2828_v29 = vsel %vm1604_vm5, %v1603_v12, %v1567_v36  ;;  %v2830_v30 = vmax.f32 %v1463_v56, %v1464_v19  ;;  %v2853_v56 = vpop.permute.xlu0 %1269 }
 0x25d   : > { %v1469_v22 = vrot.slane %v1468_v20, 4  ;;  %v1475_v32 = vsel %vm421_vm1, %v1387_v25, -inf  ;;  %vm1299_vm14 = vcmp.gt.f32.partialorder %v2731_v14, 0.0  ;;  %v1615_v35 = vrot.slane %v2823_v1, 3 }
 0x25e   : > { %v2836_v51 = vadd.f32 %v2751_v39, %v1549_v7  ;;  %v1437_v38 = vrot.slane %v1436_v23, 1  ;;  %v1477_v9 = vmax.f32 %v1475_v32, %v1476_v15  ;;  %v1553_v8 = vmax.f32 %v2830_v30, -1e+30  ;;  %v2322_v47 = vpop.f32.mrb[14].mxu1 }
 0x25f   : > { %v1470_v41 = vmax.f32 %v1468_v20, %v1469_v22  ;;  %v1390_v36 = vsel %vm1294_vm7, %v2316_v18, -1e+30  ;;  %v1389_v42 = vsel %vm1293_vm8, %v1030_v58, -1e+30  ;;  %vm1302_vm15 = vcmp.gt.f32.partialorder %v2733_v21, 0.0  ;;  %v1050_v55 = vpop.f32.mrb[15].mxu1 }
 0x260   : > { %v1606_v43 = vrot.slane %v2836_v51, 6  ;;  %v1438_v44 = vmax.f32 %v1436_v23, %v1437_v38  ;;  %v1478_v46 = vrot.slane %v1477_v9, 4  ;;  %v1485_v0 = vsel %vm421_vm1, %v1390_v36, -inf }
 0x261   : > { %v1471_v48 = vrot.slane %v1470_v41, 2  ;;  %v1484_v50 = vsel %vm421_vm1, %v1389_v42, -inf  ;;  %v1392_v26 = vsel %vm1296_vm9, %v2319_v27, -1e+30  ;;  %v1391_v62 = vsel %vm1295_vm10, %v1040_v16, -1e+30 }
 0x262   : > { %vm1301_vm2 = vcmp.gt.f32.partialorder %v2735_v17, 0.0  ;;  %v1550_v49 = vmax.f32 %v1438_v44, -1e+30  ;;  %v1479_v45 = vmax.f32 %v1477_v9, %v1478_v46  ;;  %v1486_v54 = vmax.f32 %v1484_v50, %v1485_v0  ;;  %v2325_v12 = vpop.f32.mrb[16].mxu1  ;;  %v2871_v9 = vpop.xlane.xlu0 %423 }
 0x263   : > { %v1494_v18 = vsel %vm421_vm1, %v1392_v26, -inf  ;;  %v1472_v57 = vmax.f32 %v1470_v41, %v1471_v48  ;;  %v1493_v28 = vsel %vm421_vm1, %v1391_v62, -inf  ;;  %v1394_v2 = vsel %vm1298_vm11, %v2322_v47, -1e+30  ;;  %v1060_v7 = vpop.f32.mrb[17].mxu1 }
 0x264   : > { %v1393_v53 = vsel %vm1297_vm12, %v1050_v55, -1e+30  ;;  %vm1607_vm3 = vcmask 1042434   ;;  %v2861_v58 = vadd.f32 %v2751_v39, %v1550_v49  ;;  %v1480_v61 = vrot.slane %v1479_v45, 2  ;;  %v1274_v55 = vpop.permute.xlu1 %1273 }
 0x265   : > { %v1487_v5 = vrot.slane %v1486_v54, 4  ;;  %v1495_v6 = vmax.f32 %v1493_v28, %v1494_v18  ;;  %vm1610_vm4 = vcmask 1043459   ;;  %v1473_v19 = vrot.slane %v1472_v57, 1 }
 0x266   : > { %v1503_v20 = vsel %vm421_vm1, %v1394_v2, -inf  ;;  %v1502_v15 = vsel %vm421_vm1, %v1393_v53, -inf  ;;  %v1396_v10 = vsel %vm1300_vm13, %v2325_v12, -1e+30  ;;  %vm1613_vm6 = vcmask 1044484   ;;  %v2328_v44 = vpop.f32.mrb[18].mxu1 }
 0x267   : > { %v1609_v11 = vrot.slane %v2861_v58, 5  ;;  %v1481_v23 = vmax.f32 %v1479_v45, %v1480_v61  ;;  %v1488_v25 = vmax.f32 %v1486_v54, %v1487_v5  ;;  %v1496_v27 = vrot.slane %v1495_v6, 4  ;;  %v1070_v50 = vpop.f32.mrb[19].mxu1 }
 0x268   : > { %vm1616_vm7 = vcmask 1045509   ;;  %v1474_v22 = vmax.f32 %v1472_v57, %v1473_v19  ;;  %v1504_v32 = vmax.f32 %v1502_v15, %v1503_v20  ;;  %v1512_v16 = vsel %vm421_vm1, %v1396_v10, -inf }
 0x269   : > { %v1395_v38 = vsel %vm1299_vm14, %v1060_v7, -1e+30  ;;  %vm1619_vm8 = vcmask 1046534   ;;  %v1482_v13 = vrot.slane %v1481_v23, 1  ;;  %v1489_v41 = vrot.slane %v1488_v25, 2 }
 0x26a   : > { %v1497_v36 = vmax.f32 %v1495_v6, %v1496_v27  ;;  %v1511_v42 = vsel %vm421_vm1, %v1395_v38, -inf  ;;  %v1554_v46 = vmax.f32 %v1474_v22, -1e+30  ;;  %v1505_v0 = vrot.slane %v1504_v32, 4  ;;  %v2331_v58 = vpop.f32.mrb[20].mxu1 }
 0x26b   : > { %v1513_v47 = vmax.f32 %v1511_v42, %v1512_v16  ;;  %v1398_v48 = vsel %vm1302_vm15, %v2328_v44, -1e+30  ;;  %vm1622_vm9 = vcmask 1047559   ;;  %vm1304_vm10 = vcmp.gt.f32.partialorder %v2741_v24, 0.0  ;;  %v1080_v17 = vpop.f32.mrb[21].mxu1 }
 0x26c   : > { %v1483_v14 = vmax.f32 %v1481_v23, %v1482_v13  ;;  %v1490_v26 = vmax.f32 %v1488_v25, %v1489_v41  ;;  %v1498_v62 = vrot.slane %v1497_v36, 2  ;;  %v1521_v49 = vsel %vm421_vm1, %v1398_v48, -inf }
 0x26d   : > { %vm428_vm11 = vcmp.gt.f32.partialorder %v2871_v9, 0.0  ;;  %v1506_v45 = vmax.f32 %v1504_v32, %v1505_v0  ;;  %v1514_v54 = vrot.slane %v1513_v47, 4  ;;  %v1397_v18 = vsel %vm1301_vm2, %v1070_v50, -1e+30 }
 0x26e   : > { %v1573_v21 = vadd.f32 %v2751_v39, %v1553_v8  ;;  %v1555_v57 = vmax.f32 %v1483_v14, -1e+30  ;;  %v1491_v28 = vrot.slane %v1490_v26, 1  ;;  %v1499_v2 = vmax.f32 %v1497_v36, %v1498_v62  ;;  %v2334_v16 = vpop.f32.mrb[22].mxu1 }
 0x26f   : > { %v1520_v53 = vsel %vm421_vm1, %v1397_v18, -inf  ;;  %vm1303_vm12 = vcmp.gt.f32.partialorder %v2747_v33, 0.0  ;;  %v1507_v61 = vrot.slane %v1506_v45, 2  ;;  %v1515_v5 = vmax.f32 %v1513_v47, %v1514_v54 }
 0x270   : > { %v1522_v6 = vmax.f32 %v1520_v53, %v1521_v49  ;;  %v1574_v12 = vadd.f32 %v2751_v39, %v1554_v46  ;;  %v1575_v19 = vadd.f32 %v2751_v39, %v1555_v57  ;;  %v1492_v30 = vmax.f32 %v1490_v26, %v1491_v28 }
 0x271   : > { %v1500_v20 = vrot.slane %v1499_v2, 1  ;;  %v1608_v8 = vsel %vm1607_vm3, %v1606_v43, %v2828_v29  ;;  %vm1306_vm13 = vcmp.gt.f32.partialorder %v1274_v55, 0.0  ;;  %vm1305_vm14 = vcmp.gt.f32.partialorder %v2853_v56, 0.0  ;;  %v1090_v43 = vpop.f32.mrb[23].mxu1 }
 0x272   : > { %v1508_v15 = vmax.f32 %v1506_v45, %v1507_v61  ;;  %v1516_v10 = vrot.slane %v1515_v5, 2  ;;  %v1523_v7 = vrot.slane %v1522_v6, 4  ;;  %v1611_v23 = vsel %vm1610_vm4, %v1609_v11, %v1608_v8 }
 0x273   : > { %v1556_v25 = vmax.f32 %v1492_v30, -1e+30  ;;  %v1501_v27 = vmax.f32 %v1499_v2, %v1500_v20  ;;  %v1614_v22 = vsel %vm1613_vm6, %v1612_v59, %v1611_v23  ;;  %v1618_v32 = vrot.slane %v1573_v21, 2 }
 0x274   : > { %v1509_v38 = vrot.slane %v1508_v15, 1  ;;  %v1517_v51 = vmax.f32 %v1515_v5, %v1516_v10  ;;  %v1524_v13 = vmax.f32 %v1522_v6, %v1523_v7  ;;  %v1617_v29 = vsel %vm1616_vm7, %v1615_v35, %v1614_v22 }
 0x275   : > { %v1576_v41 = vadd.f32 %v2751_v39, %v1556_v25  ;;  %v1557_v36 = vmax.f32 %v1501_v27, -1e+30  ;;  %v1620_v11 = vsel %vm1619_vm8, %v1618_v32, %v1617_v29  ;;  %v1621_v42 = vrot.slane %v1574_v12, 1 }
 0x276   : > { %v1510_v44 = vmax.f32 %v1508_v15, %v1509_v38  ;;  %v1518_v52 = vrot.slane %v1517_v51, 1  ;;  %v1525_v46 = vrot.slane %v1524_v13, 2  ;;  %v1400_v59 = vsel %vm1304_vm10, %v2331_v58, -1e+30 }
 0x277   : > { %v1624_v0 = vrot.slane %v1576_v41, 7  ;;  %v1577_v47 = vadd.f32 %v2751_v39, %v1557_v36  ;;  %v1623_v1 = vsel %vm1622_vm9, %v1621_v42, %v1620_v11  ;;  %v1530_v35 = vsel %vm421_vm1, %v1400_v59, -inf }
 0x278   : > { %v1558_v48 = vmax.f32 %v1510_v44, -1e+30  ;;  %v1519_v50 = vmax.f32 %v1517_v51, %v1518_v52  ;;  %v1526_v14 = vmax.f32 %v1524_v13, %v1525_v46  ;;  %v1640_v26 = vsel %vm428_vm11, %v1623_v1, 0.0  ;;  %v427_v44 = vpop.xlane.xlu1 %426 }
 0x279   : > { %v1625_v62 = vsel %vm1604_vm5, %v1624_v0, %v1575_v19  ;;  %v1626_v49 = vrot.slane %v1577_v47, 6  ;;  %v1646_v45 = vmul.f32 %v2767_v60, %v1640_v26  ;;  %v1399_v24 = vsel %vm1303_vm12, %v1080_v17, -1e+30 }
 0x27a   : > { %v1578_v54 = vadd.f32 %v2751_v39, %v1558_v48  ;;  %v1559_v18 = vmax.f32 %v1519_v50, -1e+30  ;;  %v1527_v21 = vrot.slane %v1526_v14, 1  ;;  %v1529_v57 = vsel %vm421_vm1, %v1399_v24, -inf  ;;  %v1749_v50 = vld [vmem:[%s384_s12] sm:$0xff] }
 0x27b   : > { %v1531_v28 = vmax.f32 %v1529_v57, %v1530_v35  ;;  %v1402_v2 = vsel %vm1306_vm13, %v2334_v16, -1e+30  ;;  %v1401_v53 = vsel %vm1305_vm14, %v1090_v43, -1e+30  ;;  %v1652_v58 = vadd.f32 %v2782_v63, %v1646_v45  ;;  %v1752_v45 = vld [vmem:[%s384_s12 + $0x18] sm:$0xff] }
 0x27c   : > { %v1628_v61 = vrot.slane %v1578_v54, 5  ;;  %v1579_v5 = vadd.f32 %v2751_v39, %v1559_v18  ;;  %v1528_v6 = vmax.f32 %v1526_v14, %v1527_v21  ;;  %v1539_v33 = vsel %vm421_vm1, %v1402_v2, -inf }
 0x27d   : > { %v1532_v12 = vrot.slane %v1531_v28, 4  ;;  %v1538_v17 = vsel %vm421_vm1, %v1401_v53, -inf  ;;  %v1654_v19 = vmax.f32 %v1652_v58, 0.0  ;;  %v1627_v30 = vsel %vm1607_vm3, %v1626_v49, %v1625_v62  ;;  %v2412_v49 = vld [vmem:[%s2522_s24 + $0x8] sm:$0xff] }
 0x27e   : > { %v1630_v20 = vrot.slane %v1579_v5, 4  ;;  %v1560_v55 = vmax.f32 %v1528_v6, -1e+30  ;;  %v1540_v8 = vmax.f32 %v1538_v17, %v1539_v33  ;;  %v1629_v56 = vsel %vm1610_vm4, %v1628_v61, %v1627_v30  ;;  %v2414_v33 = vld [vmem:[%s2584_s29] sm:$0xff] }
 0x27f   : > { %v1533_v15 = vmax.f32 %v1531_v28, %v1532_v12  ;;  %1741 = vrot.lane.b32.xlu0 %v1654_v19, %s2425_s30  ;;  %vm429_vm5 = vcmp.gt.f32.partialorder %v427_v44, 0.0  ;;  %v430_v54 = vmax.f32 %v2871_v9, 1.0  ;;  %vm1757_vm15 = vcmask 261120   ;;  %v2413_v9 = vld [vmem:[%s2522_s24] sm:$0xff] }
 0x280   : > { %v1580_v10 = vadd.f32 %v2751_v39, %v1560_v55  ;;  %v1541_v7 = vrot.slane %v1540_v8, 4  ;;  %v1631_v23 = vsel %vm1613_vm6, %v1630_v20, %v1629_v56  ;;  %v1756_v12 = vrot.slane %v2414_v33, %v2553_v31  ;;  %v1941_v31 = vld [vmem:[%s389_s15 + $0x8] sm:$0xff] }
 0x281   : > { %v1534_v25 = vrot.slane %v1533_v15, 2  ;;  %v1842_v17 = vrot.slane %v2414_v33, %v2560_v34  ;;  %v1848_v55 = vrot.slane %v2414_v33, %v2567_v37 }
 0x282   : > { %v1632_v27 = vrot.slane %v1580_v10, 3  ;;  %v1542_v22 = vmax.f32 %v1540_v8, %v1541_v7 }
 0x283   : > { %v1535_v32 = vmax.f32 %v1533_v15, %v1534_v25  ;;  %v1940_v25 = vld [vmem:[%s389_s15] sm:$0xff] }
 0x284   : > { %v1543_v16 = vrot.slane %v1542_v22, 2  ;;  %v1633_v38 = vsel %vm1616_vm7, %v1632_v27, %v1631_v23  ;;  %v2387_v37 = vpack.c.bf16 %v1941_v31, %v1940_v25 }
 0x285   : > { %v1536_v51 = vrot.slane %v1535_v32, 1 }
 0x286   : > { %v1544_v13 = vmax.f32 %v1542_v22, %v1543_v16  ;;  %v1942_v22 = vld [vmem:[%s389_s15 + $0x10] sm:$0xff] }
 0x287   : > { %v1537_v29 = vmax.f32 %v1535_v32, %v1536_v51  ;;  %v1943_v32 = vld [vmem:[%s389_s15 + $0x18] sm:$0xff] }
 0x288   : > { %v1545_v43 = vrot.slane %v1544_v13, 1  ;;  %v2391_v16 = vpack.c.bf16 %v1943_v32, %v1942_v22 }
 0x289   : > { %v1561_v41 = vmax.f32 %v1537_v29, -1e+30 }
 0x28a   : > { %v1546_v36 = vmax.f32 %v1544_v13, %v1545_v43 }
 0x28b   : > { %v1581_v11 = vadd.f32 %v2751_v39, %v1561_v41 }
 0x28c   : > { %v1562_v42 = vmax.f32 %v1546_v36, -1e+30 }
 0x28d   : > { %v1634_v52 = vrot.slane %v1581_v11, 2 }
 0x28e   : > { %v1582_v46 = vadd.f32 %v2751_v39, %v1562_v42  ;;  %v1750_v39 = vld [vmem:[%s384_s12 + $0x8] sm:$0xff] }
 0x28f   : > { %v1635_v59 = vsel %vm1619_vm8, %v1634_v52, %v1633_v38  ;;  %v2375_v62 = vpack.c.bf16 %v1750_v39, %v1749_v50  ;;  %v401_v42 = vld [vmem:[%s2584_s29 + $0x8] sm:$0x3] }
 0x290   : > { %v1636_v0 = vrot.slane %v1582_v46, 1  ;;  %v2032_v52 = vrot.slane %v401_v42, %v2488_v3 }
 0x292   : > { %v1637_v47 = vsel %vm1622_vm9, %v1636_v0, %v1635_v59  ;;  %v2038_v0 = vrot.slane %v401_v42, %v2491_v4 }
 0x293   : > { %v1641_v1 = vsel %vm429_vm5, %v1637_v47, 0.0 }
 0x294   : > { %v1647_v35 = vmul.f32 %v2767_v60, %v1641_v1  ;;  %v1751_v60 = vld [vmem:[%s384_s12 + $0x10] sm:$0xff] }
 0x295   : > { %v2379_v24 = vpack.c.bf16 %v1752_v45, %v1751_v60 }
 0x296   : > { %v1653_v48 = vadd.f32 %v2782_v63, %v1647_v35  ;;  %v431_v63 = vmax.f32 %v427_v44, 1.0  ;;  %v1947_v44 = vrot.slane %v2414_v33, %v2574_v40 }
 0x298   : > { %v1655_v14 = vmax.f32 %v1653_v48, 0.0  ;;  %2408 = vrcp.f32 %v431_v63 }
 0x299   : > { %2410 = vrcp.f32 %v430_v54 }
 0x29a   : > { %1743 = vrot.lane.b32.xlu1 %v1655_v14, %s2425_s30  ;;  %v2371_v26 = vpack.c.bf16 %v1655_v14, %v1654_v19 }
 0x29c   : > { %2372 = vmatprep.subr.bf16.mxu0 %v2371_v26 }
 0x29d   : > { %2374 = vmatpush3.bf16.msra.mxu0 %v2371_v26 }
 0x29e   : > { %2376 = vmatprep.subr.bf16.mxu0 %v2375_v62 }
 0x2a0   : > { %2340 = vmatmul.mubr.msk.f32.vlgmr.msra.gmra.mrb[10].mxu0 %vm421_vm1, %v2412_v49 }
 0x2a1   : > { %2378 = vmatpush3.bf16.msra.mxu0 %v2375_v62 }
 0x2a2   : > { %2380 = vmatprep.subr.bf16.mxu0 %v2379_v24  ;;  %v2409_v18 = vpop.eup %2408 }
 0x2a3   : > { %v2411_v57 = vpop.eup %2410 }
 0x2a5   : > { %2382 = vmatpush3.bf16.msra.mxu0 %v2379_v24 }
 0x2f1   : > { %v1742_v58 = vpop.permute.xlu0 %1741 }
 0x30c   : > { %v1744_v61 = vpop.permute.xlu1 %1743 }
 0x373   : > { %v2341_v21 = vpop.f32.mrb[10].mxu0 }
 0x374   : > { %v1738_v28 = vmul.f32 %v2409_v18, %v2341_v21  ;;  %v1728_v2 = vpop.f32.mrb[11].mxu0 }
 0x375   : > { %v1737_v53 = vmul.f32 %v2411_v57, %v1728_v2 }
 0x376   : > { %v1748_v6 = vsel %vm421_vm1, %v1738_v28, %v1744_v61 }
 0x377   : > { %v1747_v5 = vsel %vm421_vm1, %v1737_v53, %v1742_v58 }
 0x378   : > { %2350 = vmatprep.mubr.msk.f32.mxu0 %vm1757_vm15, %v1747_v5 }
 0x379   : > { %2351 = vmatmul.mubr.msk.f32.vlgmr.msra.gmra.mrb[12].mxu0 %vm1757_vm15, %v1748_v6 }
 0x37a   : > { %2357 = vmatprep.mubr.msk.f32.mxu0 %vm421_vm1, %v2413_v9 }
 0x44c   : > { %v2352_v19 = vpop.f32.mrb[12].mxu0 }
 0x44d   : > { %v1836_v30 = vadd.f32 %v2352_v19, %v1756_v12  ;;  %v1830_v20 = vpop.f32.mrb[13].mxu0 }
 0x44e   : > { %v1831_v8 = vadd.f32 %v1830_v20, %v1756_v12 }
 0x44f   : > { %v1844_v56 = vmul.f32 %v1842_v17, %v1836_v30 }
 0x450   : > { %v1843_v15 = vmul.f32 %v1842_v17, %v1831_v8 }
 0x451   : > { %v1850_v10 = vadd.f32 %v1848_v55, %v1844_v56 }
 0x452   : > { %v1849_v7 = vadd.f32 %v1848_v55, %v1843_v15 }
 0x453   : > { %v1852_v23 = vmax.f32 %v1850_v10, 0.0 }
 0x454   : > { %v1851_v27 = vmax.f32 %v1849_v7, 0.0 }
 0x455   : > { %1934 = vrot.lane.b32.xlu1 %v1852_v23, %s2425_s30 }
 0x456   : > { %1932 = vrot.lane.b32.xlu0 %v1851_v27, %s2425_s30  ;;  %v2383_v34 = vpack.c.bf16 %v1852_v23, %v1851_v27 }
 0x458   : > { %2384 = vmatprep.subr.bf16.mxu0 %v2383_v34 }
 0x459   : > { %2386 = vmatpush3.bf16.msra.mxu0 %v2383_v34 }
 0x45a   : > { %2388 = vmatprep.subr.bf16.mxu0 %v2387_v37 }
 0x45c   : > { %2358 = vmatmul.mubr.msk.f32.vlgmr.msra.gmra.mrb[14].mxu0 %vm421_vm1, %v2412_v49 }
 0x45d   : > { %2390 = vmatpush3.bf16.msra.mxu0 %v2387_v37 }
 0x45e   : > { %2392 = vmatprep.subr.bf16.mxu0 %v2391_v16 }
 0x461   : > { %2394 = vmatpush3.bf16.msra.mxu0 %v2391_v16 }
 0x4c7   : > { %v1935_v41 = vpop.permute.xlu1 %1934 }
 0x4c8   : > { %v1933_v43 = vpop.permute.xlu0 %1932 }
 0x52f   : > { %v2359_v38 = vpop.f32.mrb[14].mxu0 }
 0x530   : > { %v1929_v51 = vmul.f32 %v2409_v18, %v2359_v38  ;;  %v1919_v13 = vpop.f32.mrb[15].mxu0 }
 0x531   : > { %v1928_v29 = vmul.f32 %v2411_v57, %v1919_v13 }
 0x532   : > { %v1939_v11 = vsel %vm421_vm1, %v1929_v51, %v1935_v41 }
 0x533   : > { %v1938_v36 = vsel %vm421_vm1, %v1928_v29, %v1933_v43 }
 0x534   : > { %2368 = vmatprep.mubr.msk.f32.mxu0 %vm1757_vm15, %v1938_v36 }
 0x535   : > { %2369 = vmatmul.mubr.msk.f32.vlgmr.msra.gmra.mrb[16].mxu0 %vm1757_vm15, %v1939_v11 }
 0x608   : > { %v2370_v46 = vpop.f32.mrb[16].mxu0 }
 0x609   : > { %v2026_v59 = vadd.f32 %v2370_v46, %v1947_v44  ;;  %v2020_v47 = vpop.f32.mrb[17].mxu0 }
 0x60a   : > { %v2021_v1 = vadd.f32 %v2020_v47, %v1947_v44 }
 0x60b   : > { %v2034_v35 = vmul.f32 %v2032_v52, %v2026_v59 }
 0x60c   : > { %v2033_v48 = vmul.f32 %v2032_v52, %v2021_v1 }
 0x60d   : > { %v2040_v50 = vadd.f32 %v2038_v0, %v2034_v35 }
 0x60e   : > { %v2039_v39 = vadd.f32 %v2038_v0, %v2033_v48 }
 0x60f   : > { %2042 = vst.msk [vmem:[%s399_s17 + $0x8] sm:$0xff] %vm435_vm0, %v2040_v50 }
 0x610   : > { %2041 = vst.msk [vmem:[%s399_s17] sm:$0xff] %vm435_vm0, %v2039_v39 }
 0x611 PF: > { %s18_s27 = sadd.s32 1, %s2421_s27  }
 0x612   : > { %p15_p4 = scmp.ge.s32.totalorder %s18_s27, 5  }
 0x614   :  { %17 = sbr.rel (!%p15_p4) target bundleno = 1 (0x1), region = 97 }

</bundles_post_ra>
